<compile_context>
chip_gen: v7x
topology: tpu7x:2x2x1
jax: 0.10.0
libtpu: 0.0.40
codegen_flags: <defaults>
</compile_context>

<pallas_src>
import functools

import jax
import jax.numpy as jnp
from jax.experimental import pallas as pl
from jax.experimental.pallas import tpu as pltpu

_LANE = 128


def _accuracy_kernel(pred_ref, label_ref, out_ref, acc_ref, *,
                     n_total, needs_mask):
    g = pl.program_id(0)            # row-group axis ("parallel")
    i = pl.program_id(1)            # steps within a group ("arbitrary")
    n_steps = pl.num_programs(1)

    # Zero the per-row scratch accumulator at the start of each group.
    @pl.when(i == 0)
    def _init():
        acc_ref[...] = jnp.zeros_like(acc_ref)

    preds = pred_ref[...]                       # (TILE_N, C), native dtype
    labels = label_ref[...]                     # (TILE_N, 1), int32
    tn, c = preds.shape

    # argmax along dim=1 with first-index tie-breaking (matches torch/jnp).
    col_ids = jax.lax.broadcasted_iota(jnp.int32, (tn, c), 1)
    max_val = jnp.max(preds, axis=1, keepdims=True)              # (TILE_N, 1)
    is_max = preds == max_val
    classes = jnp.min(jnp.where(is_max, col_ids, jnp.int32(c)),
                      axis=1, keepdims=True)                      # (TILE_N, 1)

    correct = classes == labels                                   # (TILE_N, 1)

    if needs_mask:
        # Only emitted when the last block extends past N (trace-time check).
        row0 = (g * n_steps + i) * tn
        row_ids = row0 + jax.lax.broadcasted_iota(jnp.int32, (tn, 1), 0)
        correct = jnp.logical_and(correct, row_ids < n_total)

    # Per-step cost is a pure VPU add into scratch (no XLU reduce here).
    acc_ref[...] += correct.astype(jnp.int32)

    # One cross-sublane reduce per group, in the final step only.
    @pl.when(i == n_steps - 1)
    def _finalize():
        total = jnp.sum(acc_ref[...], axis=(0, 1), keepdims=True)  # (1, 1) i32
        out_ref[...] = jnp.broadcast_to(total, out_ref.shape)


def pallas_accuracy(predictions, labels, *,
                    tile_n=None, vmem_budget_bytes=24 * 1024 * 1024):
    """predictions: (N, C) floats, labels: (N,) ints -> () float32 accuracy."""
    n, c = predictions.shape
    if n == 0:
        # torch.mean of an empty tensor is NaN.
        return jnp.float32(float("nan"))

    labels_2d = labels.astype(jnp.int32).reshape(n, 1)

    # --- Auto-size the row tile against a VMEM budget -----------------------
    # Per-row VMEM bytes (lane-padded to 128 lanes):
    #   predictions: 2 buffers x ceil(C/128)*128 x itemsize
    #   labels:      2 buffers x 128 lanes x 4 B (int32, lane-padded)
    #   scratch:     1 buffer  x 128 lanes x 4 B (int32 accumulator)
    itemsize = jnp.dtype(predictions.dtype).itemsize
    c_pad = -(-c // _LANE) * _LANE
    bytes_per_row = 2 * c_pad * itemsize + 2 * _LANE * 4 + _LANE * 4

    if tile_n is None:
        tile_n = max(8, (vmem_budget_bytes // bytes_per_row) // 8 * 8)
    # Respect the (8, 128) tiling rule: block covers the full row extent, or
    # TILE_N is a multiple of 8.
    if tile_n >= n:
        tile_n = n
    else:
        tile_n = max(8, (tile_n // 8) * 8)

    total_steps = -(-n // tile_n)
    # Shard row groups across TensorCores (v7x megacore) only when the step
    # count splits evenly, so no grid step maps to a fully out-of-bounds block.
    num_groups = 2 if (total_steps >= 2 and total_steps % 2 == 0) else 1
    steps_per_group = total_steps // num_groups
    needs_mask = (total_steps * tile_n != n)

    kernel = functools.partial(_accuracy_kernel,
                               n_total=n, needs_mask=needs_mask)

    counts = pl.pallas_call(
        kernel,
        out_shape=jax.ShapeDtypeStruct((num_groups * 8, _LANE), jnp.int32),
        grid_spec=pltpu.PrefetchScalarGridSpec(
            num_scalar_prefetch=0,
            grid=(num_groups, steps_per_group),
            in_specs=[
                pl.BlockSpec((tile_n, c),
                             lambda g, i: (g * steps_per_group + i, 0)),
                pl.BlockSpec((tile_n, 1),
                             lambda g, i: (g * steps_per_group + i, 0)),
            ],
            out_specs=pl.BlockSpec((8, _LANE), lambda g, i: (g, 0)),
            scratch_shapes=[pltpu.VMEM((tile_n, 1), jnp.int32)],
        ),
        compiler_params=pltpu.CompilerParams(
            dimension_semantics=("parallel", "arbitrary"),
            vmem_limit_bytes=32 * 1024 * 1024),
    )(predictions, labels_2d)

    # Per-group partial counts live at rows g*8; sum and normalize on host side.
    group_counts = counts[::8, 0]                       # (num_groups,) int32
    total_correct = jnp.sum(group_counts)
    return total_correct.astype(jnp.float32) / jnp.float32(n)


class AbstractNeuralNetworkPallas:
    """JAX/Pallas counterpart of the abstract PyTorch base class."""

    def __init__(self):
        self.optimizer = None
        self.criterion = None

    def forward(self, x):
        # Abstract in the reference module (body is `pass`).
        return x

    def __call__(self, x):
        return self.forward(x)

    def _accuracy(self, predictions, labels):
        return pallas_accuracy(predictions, labels)


def _reference_accuracy(predictions, labels):
    classes = jnp.argmax(predictions, axis=1)
    return jnp.mean((classes == labels).astype(jnp.float32))


if __name__ == "__main__":
    key = jax.random.PRNGKey(0)
    k_pred, k_lab, k_pred2, k_lab2 = jax.random.split(key, 4)

    model = AbstractNeuralNetworkPallas()

    # Case 1: N=24, C=32.  tile_n=None -> single full block; tile_n=16 ->
    # 2 groups + tail mask (24 = 16 + 8); tile_n=8 -> 3 sequential steps.
    N, C = 24, 32
    predictions = jax.random.normal(k_pred, (N, C), dtype=jnp.float32)
    labels = jax.random.randint(k_lab, (N,), 0, C, dtype=jnp.int32)
    logits = model(predictions)
    ref = jax.block_until_ready(_reference_accuracy(logits, labels))
    for tn in (None, 16, 8):
        acc = jax.block_until_ready(pallas_accuracy(logits, labels, tile_n=tn))
        assert abs(float(acc) - float(ref)) < 1e-6, (tn, float(acc), float(ref))

    # Case 2: N=32, C=10, tile_n=8 -> 2 groups x 2 steps, no tail mask,
    # exercises the multi-step scratch accumulation path with small C.
    N2, C2 = 32, 10
    predictions2 = jax.random.normal(k_pred2, (N2, C2), dtype=jnp.float32)
    labels2 = jax.random.randint(k_lab2, (N2,), 0, C2, dtype=jnp.int32)
    logits2 = model(predictions2)
    ref2 = jax.block_until_ready(_reference_accuracy(logits2, labels2))
    acc2 = jax.block_until_ready(pallas_accuracy(logits2, labels2, tile_n=8))
    assert abs(float(acc2) - float(ref2)) < 1e-6, (float(acc2), float(ref2))

    print("KERNEL_OK")
</pallas_src>

<mosaic_0001>
module attributes {stable_mosaic.version = 11 : i64} {
  func.func @_accuracy_kernel(%arg0: i32, %arg1: i32, %arg2: memref<24x32xf32, #tpu.memory_space<vmem>>, %arg3: memref<24x1xi32, #tpu.memory_space<vmem>>, %arg4: memref<8x128xi32, #tpu.memory_space<vmem>>, %arg5: memref<24x1xi32, #tpu.memory_space<vmem>>) attributes {dimension_semantics = [#tpu.dimension_semantics<parallel>, #tpu.dimension_semantics<arbitrary>], iteration_bounds = array<i64: 1, 1>, scalar_prefetch = 0 : i64, scratch_operands = 1 : i64, tpu.core_type = #tpu.core_type<tc>, window_params = [{transform_indices = @transform_0, window_bounds = array<i64: 24, 32>}, {transform_indices = @transform_1, window_bounds = array<i64: 24, 1>}, {transform_indices = @transform_2, window_bounds = array<i64: 8, 128>}]} {
    %c0_i32 = arith.constant 0 : i32
    %0 = arith.cmpi eq, %arg1, %c0_i32 : i32
    %1 = arith.extui %0 : i1 to i32
    %c0_i32_0 = arith.constant 0 : i32
    %2 = arith.cmpi ne, %1, %c0_i32_0 : i32
    scf.if %2 {
      %c0_i32_11 = arith.constant 0 : i32
      %22 = vector.broadcast %c0_i32_11 : i32 to vector<24x1xi32>
      %c0_12 = arith.constant 0 : index
      %c0_13 = arith.constant 0 : index
      %23 = vector.load %arg5[%c0_12, %c0_13] : memref<24x1xi32, #tpu.memory_space<vmem>>, vector<24x1xi32>
      tpu.vector_store %arg5[%c0_12, %c0_13], %22 {strides = array<i32>} : memref<24x1xi32, #tpu.memory_space<vmem>>, vector<24x1xi32>,
    } else {
    }
    %c0 = arith.constant 0 : index
    %c0_1 = arith.constant 0 : index
    %3 = vector.load %arg2[%c0, %c0_1] : memref<24x32xf32, #tpu.memory_space<vmem>>, vector<24x32xf32>
    %c0_2 = arith.constant 0 : index
    %c0_3 = arith.constant 0 : index
    %4 = vector.load %arg3[%c0_2, %c0_3] : memref<24x1xi32, #tpu.memory_space<vmem>>, vector<24x1xi32>
    %5 = tpu.iota {dimensions = array<i32: 1>} : vector<24x32xi32>
    %cst = arith.constant dense<0xFF800000> : vector<24xf32>
    %6 = vector.multi_reduction <maximumf>, %3, %cst [1] : vector<24x32xf32> to vector<24xf32>
    %7 = vector.shape_cast %6 : vector<24xf32> to vector<24x1xf32>
    %8 = vector.broadcast %7 : vector<24x1xf32> to vector<24x32xf32>
    %9 = arith.cmpf oeq, %3, %8 : vector<24x32xf32>
    %c32_i32 = arith.constant 32 : i32
    %10 = vector.broadcast %c32_i32 : i32 to vector<24x32xi32>
    %11 = arith.select %9, %5, %10 : vector<24x32xi1>, vector<24x32xi32>
    %cst_4 = arith.constant dense<2147483647> : vector<24xi32>
    %12 = vector.multi_reduction <minsi>, %11, %cst_4 [1] : vector<24x32xi32> to vector<24xi32>
    %13 = vector.shape_cast %12 : vector<24xi32> to vector<24x1xi32>
    %14 = arith.cmpi eq, %13, %4 : vector<24x1xi32>
    %c0_5 = arith.constant 0 : index
    %c0_6 = arith.constant 0 : index
    %15 = vector.load %arg5[%c0_5, %c0_6] : memref<24x1xi32, #tpu.memory_space<vmem>>, vector<24x1xi32>
    %16 = arith.extui %14 : vector<24x1xi1> to vector<24x1xi32>
    %17 = arith.addi %15, %16 : vector<24x1xi32>
    %c0_7 = arith.constant 0 : index
    %c0_8 = arith.constant 0 : index
    %18 = vector.load %arg5[%c0_7, %c0_8] : memref<24x1xi32, #tpu.memory_space<vmem>>, vector<24x1xi32>
    tpu.vector_store %arg5[%c0_7, %c0_8], %17 {strides = array<i32>} : memref<24x1xi32, #tpu.memory_space<vmem>>, vector<24x1xi32>,
    %c0_i32_9 = arith.constant 0 : i32
    %19 = arith.cmpi eq, %arg1, %c0_i32_9 : i32
    %20 = arith.extui %19 : i1 to i32
    %c0_i32_10 = arith.constant 0 : i32
    %21 = arith.cmpi ne, %20, %c0_i32_10 : i32
    scf.if %21 {
      %c0_11 = arith.constant 0 : index
      %c0_12 = arith.constant 0 : index
      %22 = vector.load %arg5[%c0_11, %c0_12] : memref<24x1xi32, #tpu.memory_space<vmem>>, vector<24x1xi32>
      %23 = vector.shape_cast %22 : vector<24x1xi32> to vector<1x24x1xi32>
      %cst_13 = arith.constant dense<0> : vector<1xi32>
      %24 = vector.multi_reduction <add>, %23, %cst_13 [1, 2] : vector<1x24x1xi32> to vector<1xi32>
      %25 = vector.shape_cast %24 : vector<1xi32> to vector<1x1x1xi32>
      %26 = vector.extract %25[0, 0, 0] : i32 from vector<1x1x1xi32>
      %27 = vector.broadcast %26 : i32 to vector<1x1xi32>
      %28 = vector.shape_cast %27 : vector<1x1xi32> to vector<1x1xi32>
      %29 = vector.broadcast %28 : vector<1x1xi32> to vector<8x128xi32>
      %c0_14 = arith.constant 0 : index
      %c0_15 = arith.constant 0 : index
      %30 = vector.load %arg4[%c0_14, %c0_15] : memref<8x128xi32, #tpu.memory_space<vmem>>, vector<8x128xi32>
      tpu.vector_store %arg4[%c0_14, %c0_15], %29 {strides = array<i32>} : memref<8x128xi32, #tpu.memory_space<vmem>>, vector<8x128xi32>,
    } else {
    }
    return
  }
  func.func @transform_0(%arg0: i32, %arg1: i32) -> (i32, i32) {
    %c1_i32 = arith.constant 1 : i32
    %0 = arith.muli %arg0, %c1_i32 : i32
    %1 = arith.addi %0, %arg1 : i32
    %c0_i32 = arith.constant 0 : i32
    %c0_i32_0 = arith.constant 0 : i32
    return %1, %c0_i32 : i32, i32
  }
  func.func @transform_1(%arg0: i32, %arg1: i32) -> (i32, i32) {
    %c1_i32 = arith.constant 1 : i32
    %0 = arith.muli %arg0, %c1_i32 : i32
    %1 = arith.addi %0, %arg1 : i32
    %c0_i32 = arith.constant 0 : i32
    %c0_i32_0 = arith.constant 0 : i32
    return %1, %c0_i32 : i32, i32
  }
  func.func @transform_2(%arg0: i32, %arg1: i32) -> (i32, i32) {
    %c0_i32 = arith.constant 0 : i32
    %c0_i32_0 = arith.constant 0 : i32
    return %arg0, %c0_i32 : i32, i32
  }
}

</mosaic_0001>

<bundles_post_ra>
// kernel: tpu_custom_call.1
= control target key start
LH: loop header
LB: loop body
LE: loop exit
PB: predicated region body
PF: predicated region fallthrough
CT: control target
= control target key end

     0   :  { %vm72_vm0 = vcmask 261120   ;;  %s297_s0 = inlined_call_operand.vmem [shape: f32[24,32], index: 0, kind: input, shape index: {}]   ;;  %s298_s1 = inlined_call_operand.vmem [shape: s32[24,1], index: 1, kind: input, shape index: {}]   ;;  %s299_s2 = inlined_call_operand.hbm [shape: s32[8,128], index: 2, kind: output, shape index: {}]  }
   0x1   :  { %v64_v0 = vld [vmem:[%s297_s0] sm:$0xff]  ;;  %v66_v1 = vld [vmem:[%s297_s0 + $0x10] sm:$0xff]  ;;  %v65_v2 = vld [vmem:[%s297_s0 + $0x8] sm:$0xff] }
   0x2   :  { %v73_v3 = vsel %vm72_vm0, %v64_v0, -inf  ;;  %v79_v4 = vsel %vm72_vm0, %v66_v1, -inf }
   0x3   :  { %7 = vsyncpa [#allocation4], 0  ;;  %74 = vmax.xlane.f32.xlu0 %v73_v3  ;;  %80 = vmax.xlane.f32.xlu1 %v79_v4  ;;  %v76_v5 = vsel %vm72_vm0, %v65_v2, -inf  ;;  %v70_v6 = vlaneseq  ;;  %vm60_vm7 = vcmask 7168   ;;  %v235_v35 = vmov 0   ;;  %v67_v42 = vld [vmem:[%s298_s1] sm:$0xff] }
   0x4   :  { %61 = vst.msk [vmem:[#allocation2] sm:$0xff] %vm60_vm7, %v235_v35  ;;  %62 = vst.msk [vmem:[#allocation2 + $0x8] sm:$0xff] %vm60_vm7, %v235_v35  ;;  %v69_v52 = vld [vmem:[%s298_s1 + $0x10] sm:$0xff]  ;;  %v68_v53 = vld [vmem:[%s298_s1 + $0x8] sm:$0xff]  ;;  %s236_s1 = smov [#allocation3]  }
   0x5   :  { %v71_v7 = vand.u32 127, %v70_v6  ;;  %63 = vst.msk [vmem:[#allocation2 + $0x10] sm:$0xff] %vm60_vm7, %v235_v35  ;;  %s187_s20 = sshll.u32 %s236_s1, 4  ;;  %s188_s20 = int_to_ptr.vmem [resolvable:$true] %s187_s20 }
   0x6   :  { %s211_s22 = scalar_lea.vmem %s188_s20, 128  ;;  %p216_p1 = scmp.lt.s32.totalorder %s188_s20, %s188_s20 }
   0x7   :  { %77 = vmax.xlane.f32.xlu0 %v76_v5  ;;  %p212_p0 = scmp.ne.s32.totalorder %s188_s20, %s211_s22  ;;  %p217_p2 = scmp.lt.s32.totalorder %s211_s22, %s211_s22 }
   0x9   :  { %p218_p3 = por %p217_p2, %p216_p1 }
   0xb   :  { %v136_v45 = vld [vmem:[#allocation2] sm:$0xff]  ;;  %v137_v58 = vld [vmem:[#allocation2 + $0x8] sm:$0xff]  ;;  %p219_p4 = pnand %p218_p3, %p212_p0 }
   0xc   :  { %v138_v57 = vld [vmem:[#allocation2 + $0x10] sm:$0xff] }
  0x90   :  { %v75_v8 = vpop.xlane.xlu0 %74  ;;  %v81_v9 = vpop.xlane.xlu1 %80 }
  0x91   :  { %vm82_vm1 = vcmp.eq.f32.partialorder %v64_v0, %v75_v8  ;;  %vm84_vm2 = vcmp.eq.f32.partialorder %v66_v1, %v81_v9 }
  0x92   :  { %v85_v10 = vsel %vm82_vm1, %v71_v7, 32  ;;  %v87_v11 = vsel %vm84_vm2, %v71_v7, 32 }
  0x93   :  { %v88_v12 = vsel %vm72_vm0, %v85_v10, 2147483647  ;;  %v118_v13 = vsel %vm72_vm0, %v87_v11, 2147483647 }
  0x94   :  { %v78_v14 = vpop.xlane.xlu0 %77  ;;  %v90_v15 = vshra.s32 %v88_v12, 16  ;;  %v120_v16 = vshra.s32 %v118_v13, 16  ;;  %v89_v23 = vand.u32 65535, %v88_v12  ;;  %v119_v26 = vand.u32 65535, %v118_v13 }
  0x95   :  { %vm83_vm3 = vcmp.eq.f32.partialorder %v65_v2, %v78_v14 }
  0x96   :  { %v86_v17 = vsel %vm83_vm3, %v71_v7, 32  ;;  %v92_v18 = vcvt.s32.f32 %v90_v15  ;;  %v122_v20 = vcvt.s32.f32 %v120_v16  ;;  %v91_v25 = vcvt.s32.f32 %v89_v23 }
  0x97   :  { %v103_v19 = vsel %vm72_vm0, %v86_v17, 2147483647  ;;  %v121_v31 = vcvt.s32.f32 %v119_v26 }
  0x98   :  { %93 = vmin.xlane.f32.xlu1 %v92_v18  ;;  %v105_v21 = vshra.s32 %v103_v19, 16  ;;  %v104_v27 = vand.u32 65535, %v103_v19 }
  0x9a   :  { %v107_v22 = vcvt.s32.f32 %v105_v21  ;;  %v106_v32 = vcvt.s32.f32 %v104_v27 }
  0x9c   :  { %123 = vmin.xlane.f32.xlu1 %v122_v20  ;;  %108 = vmin.xlane.f32.xlu0 %v107_v22 }
 0x125   :  { %v94_v24 = vpop.xlane.xlu1 %93 }
 0x126   :  { %vm95_vm4 = vcmp.eq.f32.partialorder %v92_v18, %v94_v24  ;;  %v100_v36 = vcvt.f32.s32 %v94_v24 }
 0x127   :  { %v96_v28 = vsel %vm95_vm4, %v91_v25, inf }
 0x128   :  { %97 = vmin.xlane.f32.xlu0 %v96_v28  ;;  %v101_v39 = vshll.u32 %v100_v36, 16 }
 0x129   :  { %v124_v29 = vpop.xlane.xlu1 %123  ;;  %v109_v30 = vpop.xlane.xlu0 %108 }
 0x12a   :  { %vm125_vm5 = vcmp.eq.f32.partialorder %v122_v20, %v124_v29  ;;  %vm110_vm6 = vcmp.eq.f32.partialorder %v107_v22, %v109_v30  ;;  %v130_v37 = vcvt.f32.s32 %v124_v29  ;;  %v115_v40 = vcvt.f32.s32 %v109_v30 }
 0x12b   :  { %v126_v33 = vsel %vm125_vm5, %v121_v31, inf  ;;  %v111_v34 = vsel %vm110_vm6, %v106_v32, inf }
 0x12c   :  { %127 = vmin.xlane.f32.xlu0 %v126_v33  ;;  %112 = vmin.xlane.f32.xlu1 %v111_v34  ;;  %v131_v44 = vshll.u32 %v130_v37, 16  ;;  %v116_v48 = vshll.u32 %v115_v40, 16 }
 0x1b5   :  { %v98_v38 = vpop.xlane.xlu0 %97 }
 0x1b6   :  { %v99_v41 = vcvt.f32.s32 %v98_v38 }
 0x1b8   :  { %v102_v43 = vadd.s32 %v101_v39, %v99_v41 }
 0x1b9   :  { %v128_v46 = vpop.xlane.xlu0 %127  ;;  %v113_v47 = vpop.xlane.xlu1 %112 }
 0x1ba   :  { %vm133_vm8 = vcmp.eq.s32.totalorder %v102_v43, %v67_v42  ;;  %v129_v49 = vcvt.f32.s32 %v128_v46  ;;  %v114_v50 = vcvt.f32.s32 %v113_v47 }
 0x1bb   :  { %v139_v51 = vsel %vm133_vm8, 1, %v235_v35 }
 0x1bc   :  { %v142_v54 = vadd.s32 %v139_v51, %v136_v45  ;;  %v132_v55 = vadd.s32 %v131_v44, %v129_v49  ;;  %v117_v56 = vadd.s32 %v116_v48, %v114_v50 }
 0x1be   :  { %146 = vst.msk [vmem:[#allocation2] sm:$0xff] %vm60_vm7, %v142_v54  ;;  %vm135_vm9 = vcmp.eq.s32.totalorder %v132_v55, %v69_v52  ;;  %vm134_vm10 = vcmp.eq.s32.totalorder %v117_v56, %v68_v53 }
 0x1bf   :  { %v141_v59 = vsel %vm135_vm9, 1, %v235_v35  ;;  %v140_v60 = vsel %vm134_vm10, 1, %v235_v35 }
 0x1c0   :  { %v144_v61 = vadd.s32 %v141_v59, %v138_v57  ;;  %v143_v62 = vadd.s32 %v140_v60, %v137_v58 }
 0x1c2   :  { %148 = vst.msk [vmem:[#allocation2 + $0x10] sm:$0xff] %vm60_vm7, %v144_v61  ;;  %147 = vst.msk [vmem:[#allocation2 + $0x8] sm:$0xff] %vm60_vm7, %v143_v62 }
 0x1c5   :  { %v152_v63 = vld [vmem:[#allocation2] sm:$0xff] }
 0x1c6   :  { %v155_v2 = vsel %vm60_vm7, %v152_v63, 0 }
 0x1c9   :  { %v153_v0 = vld [vmem:[#allocation2 + $0x8] sm:$0xff]  ;;  %v154_v1 = vld [vmem:[#allocation2 + $0x10] sm:$0xff] }
 0x1ca   :  { %v156_v3 = vsel %vm60_vm7, %v153_v0, 0  ;;  %v157_v5 = vsel %vm60_vm7, %v154_v1, 0 }
 0x1cb   :  { %v158_v4 = vadd.s32 %v156_v3, %v155_v2 }
 0x1cd   :  { %v159_v6 = vadd.s32 %v158_v4, %v157_v5 }
 0x1cf   :  { %v161_v7 = vshrl.u32 %v159_v6, 16  ;;  %v160_v8 = vand.u32 65535, %v159_v6 }
 0x1d1   :  { %v163_v9 = vcvt.s32.f32 %v161_v7  ;;  %v162_v10 = vcvt.s32.f32 %v160_v8 }
 0x1d3   :  { %166 = vadd.xlane.f32.xlu1 %v163_v9  ;;  %164 = vadd.xlane.f32.xlu0 %v162_v10 }
 0x260   :  { %v167_v11 = vpop.xlane.xlu1 %166  ;;  %v165_v12 = vpop.xlane.xlu0 %164 }
 0x261   :  { %v169_v13 = vcvt.f32.s32 %v167_v11  ;;  %v168_v15 = vcvt.f32.s32 %v165_v12 }
 0x263   :  { %v170_v14 = vshll.u32 %v169_v13, 16 }
 0x265   :  { %v171_v16 = vadd.s32 %v170_v14, %v168_v15 }
 0x267   :  { %v172_v17 = vrot.slane %v171_v16, 4 }
 0x269   :  { %v173_v18 = vadd.s32 %v172_v17, %v171_v16 }
 0x26b   :  { %v174_v19 = vrot.slane %v173_v18, 2 }
 0x26d   :  { %v175_v20 = vadd.s32 %v174_v19, %v173_v18 }
 0x26f   :  { %v176_v21 = vrot.slane %v175_v20, 1 }
 0x271   :  { %v177_v22 = vadd.s32 %v176_v21, %v175_v20 }
 0x273   :  { %207 = vpush %v177_v22 }
 0x2a4   :  { %s208_s21 = spop %207 }
 0x2a5   :  { %v179_v23 = vstv %s208_s21 }
 0x2a6   :  { %180 = vst [vmem:[#allocation3] sm:$0xff] %v179_v23 }
 0x2a7   :  { %222 = shalt.err (!%p219_p4)
}
 0x2a8   :  { %s223_s25 = scalar_lea.hbm %s299_s2, 128 }
 0x2a9   :  { %p224_p5 = scmp.ne.s32.totalorder %s299_s2, %s223_s25  ;;  %p227_p6 = scmp.lt.u32.totalorder %s223_s25, %s299_s2 }
 0x2ab   :  { %p229_p7 = pnand %p227_p6, %p224_p5 }
 0x2ad   :  { %232 = shalt.err (!%p229_p7)
}
 0x2ae   :  { %190 = dma.vmem_to_hbm [thread:$0]  %s188_s20, 128, %s299_s2, [#allocation4]  }
 0x2af   :  { %233 = dma.done.wait [#allocation4], 128  }
 0x2b0   :  { %234 = vsyncadd [#allocation4], 4294967168 }
 0x2b1   :  { %194 = vsyncpa [#allocation4], 1 }

</bundles_post_ra>
